<compile_context>
chip_gen: v6e
topology: v6e:2x2x1
jax: 0.10.0
libtpu: 0.0.40
codegen_flags: <defaults>
</compile_context>

<pallas_src>
import jax
import jax.numpy as jnp
import numpy as np
from jax import lax
from jax.experimental import pallas as pl
from jax.experimental.pallas import tpu as pltpu

LANES = 128


def _round_up(x, m):
    return (x + m - 1) // m * m


def _channel_packing(C):
    """(Cpad, G): per-sample lane width and #samples packed per 128 lanes."""
    if C >= LANES:
        return _round_up(C, LANES), 1
    cp = 1
    while cp < C:
        cp *= 2
    return cp, LANES // cp


def _pick_time_block(T, dilation, target):
    """Largest multiple-of-8 divisor of T that is <= target and > dilation."""
    best = None
    for bt in range(8, T + 1, 8):
        if T % bt or bt <= dilation:
            continue
        if bt <= target:
            best = bt
        else:
            if best is None:
                best = bt
            break
    return best if best is not None else T


# --------------------------------------------------------------------------- #
# Kernel
# --------------------------------------------------------------------------- #
def _make_kernel(T, bt, d, halo, L, matmul_dtype):
    use_halo = halo > 0          # halo == 0  <=>  one time block (bt == T)

    def kernel(x_ref, x_hbm, wd_ref, bd_ref, w1_ref, b1_ref, o_ref,
               prev_buf, next_buf, sems):
        t = pl.program_id(1)

        if use_halo:
            # Tiny halo DMAs: round8(d) rows just before / after this tile.
            g = pl.program_id(0)
            start_prev = pl.multiple_of(jnp.maximum(t * bt - halo, 0), 8)
            start_next = pl.multiple_of(jnp.minimum((t + 1) * bt, T - halo), 8)
            cp_prev = pltpu.make_async_copy(
                x_hbm.at[g, pl.ds(start_prev, halo), :],
                prev_buf.at[pl.ds(0, halo), :], sems.at[0])
            cp_next = pltpu.make_async_copy(
                x_hbm.at[g, pl.ds(start_next, halo), :],
                next_buf.at[pl.ds(0, halo), :], sems.at[1])
            cp_prev.start()
            cp_next.start()

        x = x_ref[...]                                        # (bt, L) f32
        row = lax.broadcasted_iota(jnp.int32, (bt, 1), 0)     # local row
        t_glob = t * bt + row                                 # time index 0..T-1

        if use_halo:
            cp_prev.wait()
            cp_next.wait()
            # Align halo rows so that row i of the aligned buffer holds
            # x[t*bt + i - d]  (prev side)  /  x[t*bt + i + d]  (next side)
            # for exactly the boundary rows that the where() below selects.
            prev_al = prev_buf[...]
            s_prev = (d - halo) % bt
            if s_prev:
                prev_al = pltpu.roll(prev_al, s_prev, axis=0)
            next_al = pltpu.roll(next_buf[...], bt - d, axis=0)
            h_m = jnp.where(row >= d, pltpu.roll(x, d, axis=0), prev_al)
            h_p = jnp.where(row < bt - d, pltpu.roll(x, bt - d, axis=0), next_al)
        else:
            h_m = pltpu.roll(x, d, axis=0)
            h_p = pltpu.roll(x, bt - d, axis=0)

        # Zero the out-of-range taps (Conv1d zero padding) — also kills any
        # wrap-around / halo garbage at the sequence boundaries.
        h_m = jnp.where(t_glob >= d, h_m, 0.0)
        h_p = jnp.where(t_glob < T - d, h_p, 0.0)

        mm = matmul_dtype
        # Cast each tap BEFORE the lane concat: the (bt, 3L) operand is built
        # directly in the matmul dtype (halves the largest intermediate).
        cat = jnp.concatenate(
            [h_m.astype(mm), x.astype(mm), h_p.astype(mm)], axis=-1)

        h = jnp.dot(cat, wd_ref[...], preferred_element_type=jnp.float32)
        h = jnp.maximum(h + bd_ref[...], 0.0)                 # bias + ReLU (f32)
        h = jnp.dot(h.astype(mm), w1_ref[...],
                    preferred_element_type=jnp.float32) + b1_ref[...]
        # TODO(synk): nn.Dropout() is identity in eval mode; add
        # pltpu.prng_seed / prng_random_bits masking for training mode.
        o_ref[...] = (x + h).astype(o_ref.dtype)              # residual

    return kernel


# --------------------------------------------------------------------------- #
# Packed-layout entry point (what a full MS-TCN stack would call per layer)
# --------------------------------------------------------------------------- #
def dilated_residual_layer_packed(x_packed, packed_params, dilation, *,
                                  matmul_dtype=jnp.bfloat16, time_block=512):
    """x_packed: (Gr, T, L) f32, channels-last with G samples lane-packed."""
    Gr, T, L = x_packed.shape
    d = int(dilation)
    assert 1 <= d < T, "dilation must be in [1, T)"
    assert L % LANES == 0

    bt = _pick_time_block(T, d, time_block)
    if T % bt:
        bt = T
    n_tb = T // bt
    halo = _round_up(d, 8) if n_tb > 1 else 0
    assert halo <= bt

    wd = packed_params["wd"].astype(matmul_dtype)       # (3L, L)
    w1 = packed_params["w1"].astype(matmul_dtype)       # (L, L)
    bd = packed_params["bd"].astype(jnp.float32)        # (1, L)
    b1 = packed_params["b1"].astype(jnp.float32)        # (1, L)

    kernel = _make_kernel(T, bt, d, halo, L, matmul_dtype)

    x_spec = pl.BlockSpec((None, bt, L), lambda g, t: (g, t, 0))
    const = lambda shape: pl.BlockSpec(shape, lambda g, t: (0,) * len(shape))

    # Explicit VMEM budget: double-buffered in/out tiles + halo scratch +
    # weights + the bf16 cat intermediate, with headroom (capped for v7x).
    tile_b = bt * L * 4
    mm_b = jnp.dtype(matmul_dtype).itemsize
    vmem_est = (4 * tile_b                         # x + out, double buffered
                + 2 * tile_b                       # halo scratch
                + 2 * (3 * L * L + L * L) * mm_b   # weights (double buffered)
                + bt * 3 * L * mm_b                # cat operand
                + 2 * tile_b)                      # misc intermediates
    vmem_limit = int(min(48 * 2**20, max(16 * 2**20, 4 * vmem_est)))

    return pl.pallas_call(
        kernel,
        out_shape=jax.ShapeDtypeStruct((Gr, T, L), jnp.float32),
        grid_spec=pltpu.PrefetchScalarGridSpec(
            num_scalar_prefetch=0,
            grid=(Gr, n_tb),
            in_specs=[
                x_spec,                              # pipelined activation tile
                pl.BlockSpec(memory_space=pl.ANY),   # raw HBM view for halo DMA
                const((3 * L, L)),                   # fused dilated-conv weight
                const((1, L)),                       # dilated-conv bias
                const((L, L)),                       # 1x1 conv weight
                const((1, L)),                       # 1x1 conv bias
            ],
            out_specs=x_spec,
            scratch_shapes=[
                pltpu.VMEM((bt, L), jnp.float32),    # prev halo buffer
                pltpu.VMEM((bt, L), jnp.float32),    # next halo buffer
                pltpu.SemaphoreType.DMA((2,)),
            ]),
        compiler_params=pltpu.CompilerParams(
            dimension_semantics=("parallel", "parallel"),
            vmem_limit_bytes=vmem_limit),
    )(x_packed, x_packed, wd, bd, w1, b1)


# --------------------------------------------------------------------------- #
# Layout packing / unpacking (done ONCE per stack in production)
# --------------------------------------------------------------------------- #
def pack_activations(x_nct, Cp, G):
    """(N, C, T) -> (Gr, T, G*Cp) channels-last, G samples per lane block."""
    N, C, T = x_nct.shape
    Npad = _round_up(N, G)
    x = jnp.transpose(x_nct, (0, 2, 1))                          # (N, T, C)
    x = jnp.pad(x, ((0, Npad - N), (0, 0), (0, Cp - C)))         # (Npad, T, Cp)
    x = x.reshape(Npad // G, G, T, Cp).transpose(0, 2, 1, 3)     # (Gr, T, G, Cp)
    return x.reshape(Npad // G, T, G * Cp).astype(jnp.float32)


def unpack_activations(y_packed, N, C, Cp, G):
    Gr, T, L = y_packed.shape
    y = y_packed.reshape(Gr, T, G, Cp).transpose(0, 2, 1, 3)
    y = y.reshape(Gr * G, T, Cp)
    return jnp.transpose(y[:N, :, :C], (0, 2, 1))                # (N, C, T)


def pack_params(pt, in_channels, out_channels):
    """PyTorch Conv1d layout -> block-diagonal, tap-stacked kernel layout."""
    assert in_channels == out_channels, "residual layer needs C_in == C_out"
    C = in_channels
    Cp, G = _channel_packing(C)
    L = Cp * G

    def blockdiag(w):                       # w: (Cout, Cin) -> (L, L)
        b = np.zeros((L, L), np.float32)
        wt = np.asarray(w, np.float32).T
        for g in range(G):
            b[g * Cp:g * Cp + C, g * Cp:g * Cp + C] = wt
        return b

    wd = np.concatenate(
        [blockdiag(np.asarray(pt["wd"])[:, :, k]) for k in range(3)], axis=0)
    w1 = blockdiag(np.asarray(pt["w1"])[:, :, 0])

    def bias(b):
        bp = np.zeros((Cp,), np.float32)
        bp[:C] = np.asarray(b, np.float32)
        return np.tile(bp, G).reshape(1, L)

    return dict(wd=jnp.asarray(wd), w1=jnp.asarray(w1),
                bd=jnp.asarray(bias(pt["bd"])), b1=jnp.asarray(bias(pt["b1"])))


def init_params_pytorch_layout(key, in_channels, out_channels):
    """Deterministic synthetic params in PyTorch Conv1d layout."""
    ks = jax.random.split(key, 4)
    s = 0.1
    return dict(
        wd=s * jax.random.normal(ks[0], (out_channels, in_channels, 3),
                                 jnp.float32),          # conv_dilated.weight
        bd=s * jax.random.normal(ks[1], (out_channels,), jnp.float32),
        w1=s * jax.random.normal(ks[2], (out_channels, out_channels, 1),
                                 jnp.float32),          # conv_1x1.weight
        b1=s * jax.random.normal(ks[3], (out_channels,), jnp.float32),
    )


def ref_forward_np(x_nct, pt, dilation):
    """Numpy (float64) reference with the PyTorch eval-mode semantics."""
    x = np.asarray(x_nct, np.float64)                     # (N, C, T)
    wd = np.asarray(pt["wd"], np.float64)
    bd = np.asarray(pt["bd"], np.float64)
    w1 = np.asarray(pt["w1"], np.float64)[:, :, 0]
    b1 = np.asarray(pt["b1"], np.float64)
    N, C, T = x.shape
    d = dilation
    xt = np.transpose(x, (0, 2, 1))                       # (N, T, C)
    xm = np.zeros_like(xt); xm[:, d:] = xt[:, :T - d]     # x[t-d]
    xp = np.zeros_like(xt); xp[:, :T - d] = xt[:, d:]     # x[t+d]
    out = (np.einsum("ntc,oc->nto", xm, wd[:, :, 0])
           + np.einsum("ntc,oc->nto", xt, wd[:, :, 1])
           + np.einsum("ntc,oc->nto", xp, wd[:, :, 2]) + bd)
    out = np.maximum(out, 0.0)
    out = np.einsum("ntc,oc->nto", out, w1) + b1
    return np.transpose(xt + out, (0, 2, 1)).astype(np.float32)


if __name__ == "__main__":
    # DilatedResidualLayer(dilation=2, in_channels=32, out_channels=32)
    in_channels = out_channels = 32
    N, T, dilation = 6, 128, 2       # N=6 exercises padded samples (G=4)

    key = jax.random.PRNGKey(0)
    kx, kp = jax.random.split(key)
    x = jax.random.normal(kx, (N, in_channels, T), jnp.float32)   # NCT
    pt = init_params_pytorch_layout(kp, in_channels, out_channels)

    Cp, G = _channel_packing(in_channels)          # Cp=32, G=4 -> L=128
    params = pack_params(pt, in_channels, out_channels)
    ref = ref_forward_np(np.asarray(x), {k: np.asarray(v) for k, v in pt.items()},
                         dilation)

    xp = pack_activations(x, Cp, G)                # (Gr=2, T=128, L=128)

    def run(mdt):
        # time_block=64 -> 2 time blocks per group: exercises the halo DMAs,
        # the clamped edges, and a (2, 2) parallel grid.
        yp = dilated_residual_layer_packed(xp, params, dilation,
                                           matmul_dtype=mdt, time_block=64)
        return unpack_activations(yp, N, in_channels, Cp, G)

    # bf16 MXU operands, f32 accumulate (recommended default on v5e/v6e/v7x).
    out_bf16 = jax.block_until_ready(run(jnp.bfloat16))
    assert out_bf16.shape == (N, out_channels, T), out_bf16.shape
    np.testing.assert_allclose(np.asarray(out_bf16), ref, rtol=3e-2, atol=3e-2)

    # f32 operand path (accuracy reference); one tolerance kept for robustness
    # across MXU precision defaults.
    out_f32 = jax.block_until_ready(run(jnp.float32))
    np.testing.assert_allclose(np.asarray(out_f32), ref, rtol=3e-2, atol=3e-2)

    print("KERNEL_OK")
</pallas_src>

<mosaic_0001>
module attributes {stable_mosaic.version = 11 : i64} {
  func.func @kernel(%arg0: i32, %arg1: i32, %arg2: memref<1x64x128xf32, #tpu.memory_space<vmem>>, %arg3: memref<2x128x128xf32, #tpu.memory_space<any>>, %arg4: memref<384x128xbf16, #tpu.memory_space<vmem>>, %arg5: memref<1x128xf32, #tpu.memory_space<vmem>>, %arg6: memref<128x128xbf16, #tpu.memory_space<vmem>>, %arg7: memref<1x128xf32, #tpu.memory_space<vmem>>, %arg8: memref<1x64x128xf32, #tpu.memory_space<vmem>>, %arg9: memref<64x128xf32, #tpu.memory_space<vmem>>, %arg10: memref<64x128xf32, #tpu.memory_space<vmem>>, %arg11: memref<2x!tpu.dma_semaphore, #tpu.memory_space<semaphore_mem>>) attributes {dimension_semantics = [#tpu.dimension_semantics<parallel>, #tpu.dimension_semantics<parallel>], iteration_bounds = array<i64: 2, 2>, scalar_prefetch = 0 : i64, scratch_operands = 3 : i64, tpu.core_type = #tpu.core_type<tc>, window_params = [{transform_indices = @transform_0, window_bounds = array<i64: 1, 64, 128>}, {}, {pipeline_mode = #tpu.pipeline_mode<synchronous>, transform_indices = @transform_2, window_bounds = array<i64: 384, 128>}, {pipeline_mode = #tpu.pipeline_mode<synchronous>, transform_indices = @transform_3, window_bounds = array<i64: 1, 128>}, {pipeline_mode = #tpu.pipeline_mode<synchronous>, transform_indices = @transform_4, window_bounds = array<i64: 128, 128>}, {pipeline_mode = #tpu.pipeline_mode<synchronous>, transform_indices = @transform_5, window_bounds = array<i64: 1, 128>}, {transform_indices = @transform_6, window_bounds = array<i64: 1, 64, 128>}]} {
    %c64_i32 = arith.constant 64 : i32
    %0 = arith.muli %arg1, %c64_i32 : i32
    %c8_i32 = arith.constant 8 : i32
    %1 = arith.subi %0, %c8_i32 : i32
    %c0_i32 = arith.constant 0 : i32
    %2 = arith.maxsi %1, %c0_i32 : i32
    %3 = tpu.assume_multiple %2, 8 : i32
    %c1_i32 = arith.constant 1 : i32
    %4 = arith.addi %arg1, %c1_i32 : i32
    %c64_i32_0 = arith.constant 64 : i32
    %5 = arith.muli %4, %c64_i32_0 : i32
    %c120_i32 = arith.constant 120 : i32
    %6 = arith.minsi %5, %c120_i32 : i32
    %7 = tpu.assume_multiple %6, 8 : i32
    %c0_i32_1 = arith.constant 0 : i32
    %c0_i32_2 = arith.constant 0 : i32
    %8 = tpu.memref_slice %arg3[%arg0, %3, %c0_i32_2] : memref<2x128x128xf32, #tpu.memory_space<any>> -> memref<1x8x128xf32, #tpu.memory_space<any>>
    %9 = tpu.memref_squeeze %8 : memref<1x8x128xf32, #tpu.memory_space<any>> -> memref<8x128xf32, #tpu.memory_space<any>>
    %c0_i32_3 = arith.constant 0 : i32
    %c0_i32_4 = arith.constant 0 : i32
    %10 = tpu.memref_slice %arg9[%c0_i32_3, %c0_i32_4] : memref<64x128xf32, #tpu.memory_space<vmem>> -> memref<8x128xf32, #tpu.memory_space<vmem>>
    %11 = tpu.memref_slice %arg11[%c0_i32_1] : memref<2x!tpu.dma_semaphore, #tpu.memory_space<semaphore_mem>> -> memref<1x!tpu.dma_semaphore, #tpu.memory_space<semaphore_mem>>
    %12 = tpu.memref_squeeze %11 : memref<1x!tpu.dma_semaphore, #tpu.memory_space<semaphore_mem>> -> memref<!tpu.dma_semaphore, #tpu.memory_space<semaphore_mem>>
    tpu.enqueue_dma source(%9 : memref<8x128xf32, #tpu.memory_space<any>>) target(%10 : memref<8x128xf32, #tpu.memory_space<vmem>>) target_semaphore(%12 : memref<!tpu.dma_semaphore, #tpu.memory_space<semaphore_mem>>)
    %c1_i32_5 = arith.constant 1 : i32
    %c0_i32_6 = arith.constant 0 : i32
    %13 = tpu.memref_slice %arg3[%arg0, %7, %c0_i32_6] : memref<2x128x128xf32, #tpu.memory_space<any>> -> memref<1x8x128xf32, #tpu.memory_space<any>>
    %14 = tpu.memref_squeeze %13 : memref<1x8x128xf32, #tpu.memory_space<any>> -> memref<8x128xf32, #tpu.memory_space<any>>
    %c0_i32_7 = arith.constant 0 : i32
    %c0_i32_8 = arith.constant 0 : i32
    %15 = tpu.memref_slice %arg10[%c0_i32_7, %c0_i32_8] : memref<64x128xf32, #tpu.memory_space<vmem>> -> memref<8x128xf32, #tpu.memory_space<vmem>>
    %16 = tpu.memref_slice %arg11[%c1_i32_5] : memref<2x!tpu.dma_semaphore, #tpu.memory_space<semaphore_mem>> -> memref<1x!tpu.dma_semaphore, #tpu.memory_space<semaphore_mem>>
    %17 = tpu.memref_squeeze %16 : memref<1x!tpu.dma_semaphore, #tpu.memory_space<semaphore_mem>> -> memref<!tpu.dma_semaphore, #tpu.memory_space<semaphore_mem>>
    tpu.enqueue_dma source(%14 : memref<8x128xf32, #tpu.memory_space<any>>) target(%15 : memref<8x128xf32, #tpu.memory_space<vmem>>) target_semaphore(%17 : memref<!tpu.dma_semaphore, #tpu.memory_space<semaphore_mem>>)
    %c0 = arith.constant 0 : index
    %c0_9 = arith.constant 0 : index
    %c0_10 = arith.constant 0 : index
    %18 = vector.load %arg2[%c0, %c0_9, %c0_10] : memref<1x64x128xf32, #tpu.memory_space<vmem>>, vector<1x64x128xf32>
    %19 = vector.shape_cast %18 : vector<1x64x128xf32> to vector<64x128xf32>
    %20 = tpu.iota {dimensions = array<i32: 0>} : vector<64x1xi32>
    %c64_i32_11 = arith.constant 64 : i32
    %21 = arith.muli %arg1, %c64_i32_11 : i32
    %22 = vector.broadcast %21 : i32 to vector<64x1xi32>
    %23 = arith.addi %22, %20 : vector<64x1xi32>
    %c0_i32_12 = arith.constant 0 : i32
    %c0_i32_13 = arith.constant 0 : i32
    %24 = tpu.memref_slice %arg3[%arg0, %3, %c0_i32_13] : memref<2x128x128xf32, #tpu.memory_space<any>> -> memref<1x8x128xf32, #tpu.memory_space<any>>
    %25 = tpu.memref_squeeze %24 : memref<1x8x128xf32, #tpu.memory_space<any>> -> memref<8x128xf32, #tpu.memory_space<any>>
    %c0_i32_14 = arith.constant 0 : i32
    %c0_i32_15 = arith.constant 0 : i32
    %26 = tpu.memref_slice %arg9[%c0_i32_14, %c0_i32_15] : memref<64x128xf32, #tpu.memory_space<vmem>> -> memref<8x128xf32, #tpu.memory_space<vmem>>
    %27 = tpu.memref_slice %arg11[%c0_i32_12] : memref<2x!tpu.dma_semaphore, #tpu.memory_space<semaphore_mem>> -> memref<1x!tpu.dma_semaphore, #tpu.memory_space<semaphore_mem>>
    %28 = tpu.memref_squeeze %27 : memref<1x!tpu.dma_semaphore, #tpu.memory_space<semaphore_mem>> -> memref<!tpu.dma_semaphore, #tpu.memory_space<semaphore_mem>>
    tpu.wait_dma2 semaphore(%28 : memref<!tpu.dma_semaphore, #tpu.memory_space<semaphore_mem>>) src(%25 : memref<8x128xf32, #tpu.memory_space<any>>) dst(%26 : memref<8x128xf32, #tpu.memory_space<vmem>>)
    %c1_i32_16 = arith.constant 1 : i32
    %c0_i32_17 = arith.constant 0 : i32
    %29 = tpu.memref_slice %arg3[%arg0, %7, %c0_i32_17] : memref<2x128x128xf32, #tpu.memory_space<any>> -> memref<1x8x128xf32, #tpu.memory_space<any>>
    %30 = tpu.memref_squeeze %29 : memref<1x8x128xf32, #tpu.memory_space<any>> -> memref<8x128xf32, #tpu.memory_space<any>>
    %c0_i32_18 = arith.constant 0 : i32
    %c0_i32_19 = arith.constant 0 : i32
    %31 = tpu.memref_slice %arg10[%c0_i32_18, %c0_i32_19] : memref<64x128xf32, #tpu.memory_space<vmem>> -> memref<8x128xf32, #tpu.memory_space<vmem>>
    %32 = tpu.memref_slice %arg11[%c1_i32_16] : memref<2x!tpu.dma_semaphore, #tpu.memory_space<semaphore_mem>> -> memref<1x!tpu.dma_semaphore, #tpu.memory_space<semaphore_mem>>
    %33 = tpu.memref_squeeze %32 : memref<1x!tpu.dma_semaphore, #tpu.memory_space<semaphore_mem>> -> memref<!tpu.dma_semaphore, #tpu.memory_space<semaphore_mem>>
    tpu.wait_dma2 semaphore(%33 : memref<!tpu.dma_semaphore, #tpu.memory_space<semaphore_mem>>) src(%30 : memref<8x128xf32, #tpu.memory_space<any>>) dst(%31 : memref<8x128xf32, #tpu.memory_space<vmem>>)
    %c0_20 = arith.constant 0 : index
    %c0_21 = arith.constant 0 : index
    %34 = vector.load %arg9[%c0_20, %c0_21] : memref<64x128xf32, #tpu.memory_space<vmem>>, vector<64x128xf32>
    %c58_i32 = arith.constant 58 : i32
    %35 = tpu.dynamic_rotate %34 by %c58_i32 dim 0 : vector<64x128xf32>, i32 -> vector<64x128xf32>
    %c0_22 = arith.constant 0 : index
    %c0_23 = arith.constant 0 : index
    %36 = vector.load %arg10[%c0_22, %c0_23] : memref<64x128xf32, #tpu.memory_space<vmem>>, vector<64x128xf32>
    %c62_i32 = arith.constant 62 : i32
    %37 = tpu.dynamic_rotate %36 by %c62_i32 dim 0 : vector<64x128xf32>, i32 -> vector<64x128xf32>
    %c2_i32 = arith.constant 2 : i32
    %38 = vector.broadcast %c2_i32 : i32 to vector<64x1xi32>
    %39 = arith.cmpi sge, %20, %38 : vector<64x1xi32>
    %c2_i32_24 = arith.constant 2 : i32
    %40 = tpu.dynamic_rotate %19 by %c2_i32_24 dim 0 : vector<64x128xf32>, i32 -> vector<64x128xf32>
    %41 = vector.shape_cast %39 : vector<64x1xi1> to vector<64x1xi1>
    %42 = vector.broadcast %41 : vector<64x1xi1> to vector<64x128xi1>
    %43 = arith.select %42, %40, %35 : vector<64x128xi1>, vector<64x128xf32>
    %c62_i32_25 = arith.constant 62 : i32
    %44 = vector.broadcast %c62_i32_25 : i32 to vector<64x1xi32>
    %45 = arith.cmpi slt, %20, %44 : vector<64x1xi32>
    %c62_i32_26 = arith.constant 62 : i32
    %46 = tpu.dynamic_rotate %19 by %c62_i32_26 dim 0 : vector<64x128xf32>, i32 -> vector<64x128xf32>
    %47 = vector.shape_cast %45 : vector<64x1xi1> to vector<64x1xi1>
    %48 = vector.broadcast %47 : vector<64x1xi1> to vector<64x128xi1>
    %49 = arith.select %48, %46, %37 : vector<64x128xi1>, vector<64x128xf32>
    %c2_i32_27 = arith.constant 2 : i32
    %50 = vector.broadcast %c2_i32_27 : i32 to vector<64x1xi32>
    %51 = arith.cmpi sge, %23, %50 : vector<64x1xi32>
    %cst = arith.constant 0.000000e+00 : f32
    %52 = vector.shape_cast %51 : vector<64x1xi1> to vector<64x1xi1>
    %53 = vector.broadcast %52 : vector<64x1xi1> to vector<64x128xi1>
    %54 = vector.broadcast %cst : f32 to vector<64x128xf32>
    %55 = arith.select %53, %43, %54 : vector<64x128xi1>, vector<64x128xf32>
    %c126_i32 = arith.constant 126 : i32
    %56 = vector.broadcast %c126_i32 : i32 to vector<64x1xi32>
    %57 = arith.cmpi slt, %23, %56 : vector<64x1xi32>
    %cst_28 = arith.constant 0.000000e+00 : f32
    %58 = vector.shape_cast %57 : vector<64x1xi1> to vector<64x1xi1>
    %59 = vector.broadcast %58 : vector<64x1xi1> to vector<64x128xi1>
    %60 = vector.broadcast %cst_28 : f32 to vector<64x128xf32>
    %61 = arith.select %59, %49, %60 : vector<64x128xi1>, vector<64x128xf32>
    %62 = arith.truncf %55 : vector<64x128xf32> to vector<64x128xbf16>
    %63 = arith.truncf %19 : vector<64x128xf32> to vector<64x128xbf16>
    %64 = arith.truncf %61 : vector<64x128xf32> to vector<64x128xbf16>
    %65 = tpu.concatenate %62, %63, %64 in 1 : vector<64x128xbf16>, vector<64x128xbf16>, vector<64x128xbf16> -> vector<64x384xbf16>
    %c0_29 = arith.constant 0 : index
    %c0_30 = arith.constant 0 : index
    %66 = vector.load %arg4[%c0_29, %c0_30] : memref<384x128xbf16, #tpu.memory_space<vmem>>, vector<384x128xbf16>
    %cst_31 = arith.constant dense<0.000000e+00> : vector<64x128xf32>
    %67 = tpu.matmul %65, %66, %cst_31 {dimension_numbers = #tpu.dot_dimension_numbers<[1], [0], [0], [1], [0, 0, 1, 1], [], []>} : vector<64x384xbf16>, vector<384x128xbf16>, vector<64x128xf32> -> vector<64x128xf32>
    %c0_32 = arith.constant 0 : index
    %c0_33 = arith.constant 0 : index
    %68 = vector.load %arg5[%c0_32, %c0_33] : memref<1x128xf32, #tpu.memory_space<vmem>>, vector<1x128xf32>
    %69 = vector.broadcast %68 : vector<1x128xf32> to vector<64x128xf32>
    %70 = arith.addf %67, %69 : vector<64x128xf32>
    %cst_34 = arith.constant 0.000000e+00 : f32
    %71 = vector.broadcast %cst_34 : f32 to vector<64x128xf32>
    %72 = arith.maximumf %70, %71 : vector<64x128xf32>
    %73 = arith.truncf %72 : vector<64x128xf32> to vector<64x128xbf16>
    %c0_35 = arith.constant 0 : index
    %c0_36 = arith.constant 0 : index
    %74 = vector.load %arg6[%c0_35, %c0_36] : memref<128x128xbf16, #tpu.memory_space<vmem>>, vector<128x128xbf16>
    %cst_37 = arith.constant dense<0.000000e+00> : vector<64x128xf32>
    %75 = tpu.matmul %73, %74, %cst_37 {dimension_numbers = #tpu.dot_dimension_numbers<[1], [0], [0], [1], [0, 0, 1, 1], [], []>} : vector<64x128xbf16>, vector<128x128xbf16>, vector<64x128xf32> -> vector<64x128xf32>
    %c0_38 = arith.constant 0 : index
    %c0_39 = arith.constant 0 : index
    %76 = vector.load %arg7[%c0_38, %c0_39] : memref<1x128xf32, #tpu.memory_space<vmem>>, vector<1x128xf32>
    %77 = vector.broadcast %76 : vector<1x128xf32> to vector<64x128xf32>
    %78 = arith.addf %75, %77 : vector<64x128xf32>
    %79 = arith.addf %19, %78 : vector<64x128xf32>
    %c0_40 = arith.constant 0 : index
    %c0_41 = arith.constant 0 : index
    %c0_42 = arith.constant 0 : index
    %80 = vector.load %arg8[%c0_40, %c0_41, %c0_42] : memref<1x64x128xf32, #tpu.memory_space<vmem>>, vector<1x64x128xf32>
    %81 = vector.shape_cast %80 : vector<1x64x128xf32> to vector<64x128xf32>
    %82 = vector.shape_cast %79 : vector<64x128xf32> to vector<1x64x128xf32>
    tpu.vector_store %arg8[%c0_40, %c0_41, %c0_42], %82 {strides = array<i32>} : memref<1x64x128xf32, #tpu.memory_space<vmem>>, vector<1x64x128xf32>,
    return
  }
  func.func @transform_0(%arg0: i32, %arg1: i32) -> (i32, i32, i32) {
    %c0_i32 = arith.constant 0 : i32
    %c0_i32_0 = arith.constant 0 : i32
    return %arg0, %arg1, %c0_i32 : i32, i32, i32
  }
  func.func @transform_2(%arg0: i32, %arg1: i32) -> (i32, i32) {
    %c0_i32 = arith.constant 0 : i32
    %c0_i32_0 = arith.constant 0 : i32
    %c0_i32_1 = arith.constant 0 : i32
    return %c0_i32, %c0_i32_0 : i32, i32
  }
  func.func @transform_3(%arg0: i32, %arg1: i32) -> (i32, i32) {
    %c0_i32 = arith.constant 0 : i32
    %c0_i32_0 = arith.constant 0 : i32
    %c0_i32_1 = arith.constant 0 : i32
    return %c0_i32, %c0_i32_0 : i32, i32
  }
  func.func @transform_4(%arg0: i32, %arg1: i32) -> (i32, i32) {
    %c0_i32 = arith.constant 0 : i32
    %c0_i32_0 = arith.constant 0 : i32
    %c0_i32_1 = arith.constant 0 : i32
    return %c0_i32, %c0_i32_0 : i32, i32
  }
  func.func @transform_5(%arg0: i32, %arg1: i32) -> (i32, i32) {
    %c0_i32 = arith.constant 0 : i32
    %c0_i32_0 = arith.constant 0 : i32
    %c0_i32_1 = arith.constant 0 : i32
    return %c0_i32, %c0_i32_0 : i32, i32
  }
  func.func @transform_6(%arg0: i32, %arg1: i32) -> (i32, i32, i32) {
    %c0_i32 = arith.constant 0 : i32
    %c0_i32_0 = arith.constant 0 : i32
    return %arg0, %arg1, %c0_i32 : i32, i32, i32
  }
}

</mosaic_0001>

<bundles_post_ra>
// kernel: tpu_custom_call.1
= control target key start
LH: loop header
LB: loop body
LE: loop exit
PB: predicated region body
PF: predicated region fallthrough
CT: control target
= control target key end

     0   :  { %s2317_s0 = inlined_call_operand.hbm [shape: f32[2,128,128], index: 0, kind: input, shape index: {}]   ;;  %s2318_s1 = inlined_call_operand.hbm [shape: f32[2,128,128], index: 1, kind: input, shape index: {}]   ;;  %s2319_s2 = inlined_call_operand.hbm [shape: bf16[384,128], index: 2, kind: input, shape index: {}]   ;;  %s2320_s3 = inlined_call_operand.vmem [shape: f32[1,128], index: 3, kind: input, shape index: {}]   ;;  %s2321_s4 = inlined_call_operand.hbm [shape: bf16[128,128], index: 4, kind: input, shape index: {}]   ;;  %s2322_s5 = inlined_call_operand.vmem [shape: f32[1,128], index: 5, kind: input, shape index: {}]   ;;  %s2323_s6 = inlined_call_operand.hbm [shape: f32[2,128,128], index: 6, kind: output, shape index: {}]  }
   0x1   :  { %2333 = sst [smem:[#allocation27_spill]] %s2319_s2 }
   0x2   :  { %2334 = sst [smem:[#allocation28_spill]] %s2320_s3 }
   0x3   :  { %2335 = sst [smem:[#allocation29_spill]] %s2321_s4 }
   0x4   :  { %2336 = sst [smem:[#allocation30_spill]] %s2322_s5 }
   0x5   :  { %2337 = sst [smem:[#allocation31_spill]] %s2323_s6 }
   0x6   :  { %11 = vsyncpa [#allocation6], 0 }
   0x7   :  { %13 = vsyncpa [#allocation6 + $0x1], 0 }
   0x8   :  { %14 = vsyncpa [#allocation9], 0 }
   0x9   :  { %15 = vsyncpa [#allocation7], 0 }
   0xa   :  { %17 = vsyncpa [#allocation7 + $0x1], 0  ;;  %s1857_s21 = smov 0   ;;  %s1859_s22 = smov 0  }
   0xb   :  { %s1861_s23 = smov 0   ;;  %s1863_s24 = smov 0  }
   0xc   :  { %s1865_s25 = smov 0   ;;  %s1867_s26 = smov 0  }
   0xd   :  { %s1869_s27 = smov 0   ;;  %s1871_s28 = smov 0  }
   0xe LB: > { %2338 = sst [smem:[#allocation23_spill]] %s1780_s21  ;;  %s1224_s29 = sadd.s32 4294967295, %s1808_s28   ;;  %s1808_s28 = sphi %s1871_s28, %s23_s28   ;;  %s1804_s27 = sphi %s1869_s27, %s2373_s27   ;;  %s1800_s26 = sphi %s1867_s26, %s2372_s26   ;;  %s1796_s25 = sphi %s1865_s25, %s2371_s25   ;;  %s1792_s24 = sphi %s1863_s24, %s2370_s24   ;;  %s1788_s23 = sphi %s1861_s23, %s2369_s23   ;;  %s1784_s22 = sphi %s1859_s22, %s2368_s22   ;;  %s1780_s21 = sphi %s1857_s21, %s2367_s21  }
   0xf   : > { %s1225_s30 = sadd.s32 4294967294, %s1808_s28   ;;  %p57_p0 = scmp.ne.s32.totalorder %s1784_s22, %s1780_s21 }
  0x10   : > { %p1901_p1 = scmp.eq.s32.totalorder %s1224_s29, 0  ;;  %p1905_p2 = scmp.eq.s32.totalorder %s1224_s29, 3 }
  0x11   : > { %p173_p3 = scmp.eq.s32.totalorder %s1225_s30, 3  ;;  %p1226_p5 = scmp.ge.s32.totalorder %s1808_s28, 1 }
  0x12   : > { %s2339_s7 = scalar_select %p1901_p1, 1, 0 }
  0x13   : > { %p1911_p4 = por %p1901_p1, %p57_p0  ;;  %p1916_p6 = por %p173_p3, %p57_p0 }
  0x14   : > { %p180_p7 = scmp.lt.s32.totalorder %s1808_s28, 5  ;;  %s1810_s12 = smov [#allocation8]  }
  0x15   : > { %s2341_s9 = scalar_select %p1911_p4, 1, 0 }
  0x16   : > { %s2342_s10 = scalar_select %p1916_p6, 1, 0 }
  0x17   : > { %p1921_p8 = pnand %p1226_p5, %p180_p7  ;;  %s192_s13 = sshll.u32 %s1810_s12, 4  ;;  %s193_s13 = int_to_ptr.vmem [resolvable:$true] %s192_s13 }
  0x18   : > { %2343 = sst [smem:[#allocation24_spill]] %s2342_s10  ;;  %s1811_s15 = smov [#allocation10]  }
  0x19   : > { %p1453_p9 = pneg %p1921_p8  ;;  %s208_s16 = sshll.u32 %s1811_s15, 4  ;;  %s209_s16 = int_to_ptr.vmem [resolvable:$true] %s208_s16 }
  0x1a   : > { %s1591_s17 = scalar_lea.vmem %s193_s13, 3072  ;;  %p1599_p3 = scmp.lt.s32.totalorder %s193_s13, %s193_s13 }
  0x1b   : > { %p1929_p10 = pnand %p1453_p9, %p1901_p1  ;;  %p1592_p12 = scmp.ne.s32.totalorder %s193_s13, %s1591_s17 }
  0x1c   : > { %p1600_p5 = scmp.lt.s32.totalorder %s1591_s17, %s1591_s17 }
  0x1d   : > { %p1582_p11 = pneg %p1929_p10 }
  0x1e   : > { %p1601_p7 = por %p1600_p5, %p1599_p3 }
  0x1f   : > { %p1594_p13 = pnand %p1592_p12, %p1582_p11 }
  0x21   : > { %p1595_p0 = pneg %p1594_p13 }
  0x23   : > { %p1602_p9 = pnand %p1601_p7, %p1595_p0 }
  0x25   : > { %1605 = shalt.err (!%p1602_p9)
}
  0x26   : > { %s1812_s18 = smov 64   ;;  %s1813_s19 = smov 4  }
  0x27   : > { %s2346_s2 = sld [smem:[#allocation27_spill]]  ;;  %s1617_s30 = scalar_lea.vmem %s209_s16, 1024 }
  0x28   : > { %p1618_p6 = scmp.ne.s32.totalorder %s209_s16, %s1617_s30  ;;  %p1625_p1 = scmp.lt.s32.totalorder %s209_s16, %s209_s16 }
  0x29   : > { %p1626_p4 = scmp.lt.s32.totalorder %s1617_s30, %s1617_s30 }
  0x2a   : > { %p1620_p12 = pnand %p1618_p6, %p1582_p11 }
  0x2b   : > { %p1627_p3 = por %p1626_p4, %p1625_p1 }
  0x2c   : > { %p1621_p13 = pneg %p1620_p12 }
  0x2d   : > { %1456 = dma.hbm_to_vmem [thread:$0]  (!%p1929_p10), %s2346_s2, 3072, %s193_s13, [#allocation9], %s1812_s18, %s1812_s18, %s1813_s19  }
  0x2e   : > { %p1628_p0 = pnand %p1627_p3, %p1621_p13 }
  0x30   : > { %1631 = shalt.err (!%p1628_p0)
}
  0x31   : > { %s2347_s4 = sld [smem:[#allocation29_spill]]  ;;  %s32_s13 = sadd.s32 1, %s1800_s26 }
  0x32   : > { %s35_s17 = sadd.s32 1, %s1804_s27  ;;  %p33_p1 = scmp.ge.s32.totalorder %s32_s13, 2 }
  0x33   : > { %s44_s14 = sadd.s32 1, %s1788_s23  ;;  %p51_p4 = scmp.ne.s32.totalorder %s1788_s23, %s1784_s22 }
  0x34   : > { %p52_p6 = scmp.eq.s32.totalorder %s1808_s28, 0  ;;  %s2375_s13 = smov (%p33_p1, %s32_s13), 0 }
  0x35   : > { %2348 = sst [smem:[#allocation25_spill]] %s2375_s13  ;;  %s2377_s17 = smov (!%p33_p1, %s35_s17), %s1804_s27 }
  0x36   : > { %s40_s20 = ssub.s32 %s1800_s26, %s2375_s13  ;;  %p1962_p11 = por %p52_p6, %p51_p4 }
  0x37   : > { %1459 = dma.hbm_to_vmem [thread:$0]  (!%p1929_p10), %s2347_s4, 1024, %s209_s16, [#allocation9], %s1812_s18, %s1812_s18, %s1813_s19  }
  0x38   : > { %p37_p10 = scmp.ge.s32.totalorder %s2377_s17, 2  ;;  %p1968_p5 = por %p1905_p2, %p51_p4 }
  0x39   : > { %p1470_p7 = scmp.lt.s32.totalorder %s1808_s28, 4  ;;  %s225_s18 = sand.u32 1, %s1788_s23  }
  0x3a   : > { %s2350_s16 = scalar_select %p1968_p5, 1, 0 }
  0x3b   : > { %s2379_s17 = smov (%p37_p10, %s2377_s17), 0  ;;  %s1230_s19 = sshll.u32 %s225_s18, 6 }
  0x3c   : > { %2351 = sst [smem:[#allocation26_spill]] %s2350_s16  ;;  %s39_s30 = ssub.s32 %s1804_s27, %s2379_s17 }
  0x3d   : > { %s41_s12 = sor.u32 %s40_s20, %s39_s30  ;;  %s1231_s15 = sshll.u32 %s1800_s26, 3 }
  0x3e   : > { %p42_p9 = scmp.eq.s32.totalorder %s41_s12, 0  ;;  %s1232_s2 = sshll.u32 %s1804_s27, 4 }
  0x3f   : > { %s235_s4 = sadd.s32 %s1232_s2, %s1231_s15  ;;  %s229_s13 = scalar_lea.vmem [#allocation5], %s1230_s19 }
  0x40   : > { %s238_s8 = sshll.u32 %s229_s13, 4  ;;  %s1233_s21 = sshll.u32 %s235_s4, 7  ;;  %s239_s8 = int_to_ptr.vmem [resolvable:$true] %s238_s8 }
  0x41   : > { %s1981_s10 = scalar_select %p42_p9, %s1788_s23, %s44_s14  }
  0x42   : > { %s237_s5 = scalar_lea.hbm %s2317_s0, %s1233_s21  ;;  %p1990_p2 = pnand %p1470_p7, %p1962_p11 }
  0x43   : > { %s226_s20 = scalar_lea.sflag [#allocation6], %s225_s18  ;;  %s1645_s2 = scalar_lea.vmem %s239_s8, 1024 }
  0x44   : > { %p1634_p12 = pneg %p1990_p2  ;;  %p1646_p13 = scmp.ne.s32.totalorder %s239_s8, %s1645_s2 }
  0x45   : > { %s1814_s4 = smov [#allocation5]  }
  0x46   : > { %p1648_p3 = pnand %p1646_p13, %p1634_p12  ;;  %s1650_s13 = sshll.u32 %s1814_s4, 4  ;;  %s1651_s13 = int_to_ptr.vmem [resolvable:$false] %s1650_s13 }
  0x47   : > { %s1652_s14 = scalar_lea.vmem %s1651_s13, 2048  ;;  %p1653_p1 = scmp.lt.s32.totalorder %s239_s8, %s1651_s13 }
  0x48   : > { %p1649_p0 = pneg %p1648_p3  ;;  %p1654_p4 = scmp.lt.s32.totalorder %s1652_s14, %s1645_s2 }
  0x4a   : > { %p1655_p6 = por %p1654_p4, %p1653_p1 }
  0x4c   : > { %p1656_p10 = pnand %p1655_p6, %p1649_p0 }
  0x4e   : > { %1659 = shalt.err (!%p1656_p10)
}
  0x4f   : > { %s1815_s6 = smov 128   ;;  %s1816_s21 = smov 8  }
  0x50   : > { %1463 = dma.hbm_to_vmem [thread:$0]  (!%p1990_p2), %s237_s5, 1024, %s239_s8, %s226_s20, %s1815_s6, %s1815_s6, %s1816_s21  }
  0x51   : > { %250 = sbr.rel (%p1921_p8) target bundleno = 625 (0x271), region = 40  ;;  %s2001_s29 = sand.u32 (!%p1921_p8), 1, %s1784_s22  }
  0x52   : > { %s1235_s16 = sshll.u32 (!%p1921_p8), %s2001_s29, 6  ;;  %s253_s18 = scalar_lea.sflag (!%p1921_p8), [#allocation6], %s2001_s29 }
  0x53   : > { %s2007_s19 = scalar_lea.vmem (!%p1921_p8), [#allocation5], %s1235_s16  ;;  %p2353_p11 = scmp.ne.s32.totalorder (!%p1921_p8), %s2341_s9, 0 }
  0x56   : > { %1763 = dma.done.wait (%p2353_p11), %s253_s18, 1024  }
  0x57   : > { %1765 = vsyncadd (%p2353_p11), %s253_s18, 4294966272  ;;  %p2354_p7 = scmp.ne.s32.totalorder %s2339_s7, 0 }
  0x59   : > { %1767 = dma.done.wait (%p2354_p7), [#allocation9], 4096  }
  0x5a   : > { %1769 = vsyncadd (%p2354_p7), [#allocation9], 4294963200  ;;  %s2018_s3 = sshll.u32 %s1792_s24, 6  ;;  %v340_v0 = vlaneseq  ;;  %s1242_s11 = sshll.u32 %s1796_s25, 7  ;;  %v2057_v15 = vld [vmem:[%s2007_s19] sm:$0xff]  ;;  %v2060_v16 = vld [vmem:[%s2007_s19 + $0x8] sm:$0xff] }
  0x5b   : > { %s1240_s5 = sadd.s32 4294967288, %s2018_s3  ;;  %v349_v2 = vstv %s2018_s3  ;;  %s1817_s9 = smov [#allocation2]   ;;  %v2063_v17 = vld [vmem:[%s2007_s19 + $0x10] sm:$0xff]  ;;  %v2073_v21 = vld [vmem:[%s2007_s19 + $0x18] sm:$0xff]  ;;  %v2076_v22 = vld [vmem:[%s2007_s19 + $0x20] sm:$0xff] }
  0x5c   : > { %p296_p8 = scmp.gt.s32.totalorder %s1240_s5, 0  ;;  %v2022_v1 = vshrl.u32 %v340_v0, 7  ;;  %s313_s30 = sshll.u32 %s1817_s9, 4  ;;  %v2079_v23 = vld [vmem:[%s2007_s19 + $0x28] sm:$0xff]  ;;  %v2085_v24 = vld [vmem:[%s2007_s19 + $0x30] sm:$0xff]  ;;  %v2088_v25 = vld [vmem:[%s2007_s19 + $0x38] sm:$0xff]  ;;  %s2030_s30 = int_to_ptr.vmem [resolvable:$true] %s313_s30 }
  0x5d   : > { %s1312_s7 = sadd.s32 64, %s2018_s3  ;;  %s1818_s13 = smov [#allocation3]  }
  0x5e   : > { %s2381_s5 = smov (!%p296_p8, %s1240_s5), 0  ;;  %v342_v3 = vadd.s32 8, %v2022_v1  ;;  %v343_v4 = vadd.s32 16, %v2022_v1  ;;  %v344_v5 = vadd.s32 24, %v2022_v1  ;;  %v345_v6 = vadd.s32 32, %v2022_v1  ;;  %p2042_p9 = scmp.lt.s32.totalorder %s1312_s7, 120 }
  0x5f   : > { %v346_v7 = vadd.s32 40, %v2022_v1  ;;  %v347_v8 = vadd.s32 48, %v2022_v1  ;;  %v2035_v9 = vadd.s32 56, %v2022_v1  ;;  %v2038_v10 = vadd.s32 %v349_v2, %v2022_v1  ;;  %s303_s15 = sadd.s32 %s1242_s11, %s2381_s5  ;;  %s328_s14 = sshll.u32 %s1818_s13, 4  ;;  %s329_s14 = int_to_ptr.vmem [resolvable:$true] %s328_s14 }
  0x60   : > { %v2048_v11 = vadd.s32 %v349_v2, %v342_v3  ;;  %v2050_v12 = vadd.s32 %v349_v2, %v343_v4  ;;  %v2052_v13 = vadd.s32 %v349_v2, %v344_v5  ;;  %v2054_v14 = vadd.s32 %v349_v2, %v345_v6  ;;  %s1243_s8 = sshll.u32 %s303_s15, 4  ;;  %s1662_s5 = scalar_lea.hbm %s2318_s1, 4096 }
  0x61   : > { %v2065_v18 = vadd.s32 %v349_v2, %v346_v7  ;;  %v2067_v19 = vadd.s32 %v349_v2, %v347_v8  ;;  %v2070_v20 = vadd.s32 %v349_v2, %v2035_v9  ;;  %s305_s4 = scalar_lea.hbm %s2318_s1, %s1243_s8 }
  0x62   : > { %s1660_s6 = scalar_lea.hbm %s305_s4, 128  ;;  %p1663_p12 = scmp.lt.s32.totalorder %s305_s4, %s2318_s1 }
  0x63   : > { %p1661_p2 = scmp.ne.s32.totalorder %s305_s4, %s1660_s6  ;;  %p1664_p13 = scmp.lt.s32.totalorder %s1662_s5, %s1660_s6 }
  0x65   : > { %p1665_p3 = por %p1664_p13, %p1663_p12 }
  0x67   : > { %p1666_p0 = pnand %p1665_p3, %p1661_p2 }
  0x69   : > { %1669 = shalt.err (!%p1666_p0)  }
  0x6a   : > { %s1670_s19 = scalar_lea.vmem %s2030_s30, 128  ;;  %s1674_s8 = scalar_lea.vmem %s2030_s30, 1024 }
  0x6b   : > { %p1671_p1 = scmp.ne.s32.totalorder %s2030_s30, %s1670_s19  ;;  %p1675_p4 = scmp.lt.s32.totalorder %s2030_s30, %s2030_s30 }
  0x6c   : > { %p1676_p6 = scmp.lt.s32.totalorder %s1674_s8, %s1670_s19 }
  0x6e   : > { %p1677_p10 = por %p1676_p6, %p1675_p4 }
  0x70   : > { %p1678_p11 = pnand %p1677_p10, %p1671_p1 }
  0x72   : > { %1681 = shalt.err (!%p1678_p11)  }
  0x73   : > { %316 = dma.hbm_to_vmem [thread:$0]  %s305_s4, 128, %s2030_s30, [#allocation4] }
  0x74   : > { %s2383_s7 = smov (!%p2042_p9, %s1312_s7), 120 }
  0x75   : > { %s317_s20 = sadd.s32 %s1242_s11, %s2383_s7 }
  0x76   : > { %s1244_s2 = sshll.u32 %s317_s20, 4 }
  0x77   : > { %s319_s21 = scalar_lea.hbm %s2318_s1, %s1244_s2 }
  0x78   : > { %s1682_s18 = scalar_lea.hbm %s319_s21, 128  ;;  %p1685_p8 = scmp.lt.s32.totalorder %s319_s21, %s2318_s1 }
  0x79   : > { %p1683_p7 = scmp.ne.s32.totalorder %s319_s21, %s1682_s18  ;;  %p1686_p2 = scmp.lt.s32.totalorder %s1662_s5, %s1682_s18 }
  0x7b   : > { %p1687_p12 = por %p1686_p2, %p1685_p8 }
  0x7d   : > { %p1688_p13 = pnand %p1687_p12, %p1683_p7 }
  0x7f   : > { %1691 = shalt.err (!%p1688_p13)  }
  0x80   : > { %s1692_s3 = scalar_lea.vmem %s329_s14, 128  ;;  %s1696_s30 = scalar_lea.vmem %s329_s14, 1024 }
  0x81   : > { %p1693_p9 = scmp.ne.s32.totalorder %s329_s14, %s1692_s3  ;;  %p1697_p3 = scmp.lt.s32.totalorder %s329_s14, %s329_s14 }
  0x82   : > { %p1698_p0 = scmp.lt.s32.totalorder %s1696_s30, %s1692_s3 }
  0x84   : > { %p1699_p1 = por %p1698_p0, %p1697_p3 }
  0x86   : > { %p1700_p4 = pnand %p1699_p1, %p1693_p9 }
  0x88   : > { %1703 = shalt.err (!%p1700_p4)  }
  0x89   : > { %331 = dma.hbm_to_vmem [thread:$0]  %s319_s21, 128, %s329_s14, [#allocation4 + $0x1] }
  0x8a   : > { %s2116_s11 = scalar_lea.vmem [#allocation11], %s1235_s16 }
  0x8b   : > { %1770 = dma.done.wait [#allocation4], 128 }
  0x8c   : > { %1771 = vsyncadd [#allocation4], 4294967168 }
  0x8d   : > { %1772 = dma.done.wait [#allocation4 + $0x1], 128 }
  0x8e   : > { %1773 = vsyncadd [#allocation4 + $0x1], 4294967168  ;;  %v577_v26 = vpack.c.bf16 %v2060_v16, %v2057_v15  ;;  %vm404_vm0 = vcmp.lt.s32.totalorder %v2022_v1, 6  ;;  %v469_v27 = vrot.slane %v2057_v15, 2  ;;  %v470_v28 = vrot.slane %v2060_v16, 2  ;;  %v1548_v33 = vld [vmem:[#allocation8 + $0x78] sm:$0xff]  }
  0x8f   : > { %v471_v29 = vrot.slane %v2063_v17, 2  ;;  %vm541_vm1 = vcmp.lt.s32.totalorder %v2038_v10, 126  ;;  %vm542_vm2 = vcmp.lt.s32.totalorder %v2048_v11, 126  ;;  %v1549_v34 = vld [vmem:[#allocation8 + $0x38] sm:$0xff]   ;;  %1313 = vmatprep.subr.bf16.mxu0 %v1548_v33  ;;  %v1550_v35 = vld [vmem:[#allocation8 + $0x70] sm:$0xff]   ;;  %v1553_v38 = vld [vmem:[#allocation8 + $0x68] sm:$0xff]  }
  0x90   : > { %816 = vmatprep.mubr.bf16.mxu0 %v577_v26  ;;  %v483_v31 = vsel %vm404_vm0, %v469_v27, %v470_v28  ;;  %vm1282_vm3 = vmpackc.low %vm542_vm2, %vm541_vm1  ;;  %1314 = vmatpush3.bf16.msra.mxu0 %v1549_v34  ;;  %v1551_v36 = vld [vmem:[#allocation8 + $0xb8] sm:$0xff]   ;;  %v1552_v37 = vld [vmem:[#allocation8 + $0x30] sm:$0xff]   ;;  %vm379_vm4 = vcmp.lt.s32.totalorder %v2022_v1, 2  ;;  %vm413_vm5 = vcmp.ge.s32.totalorder %v2022_v1, 2  ;;  %v421_v51 = vrot.slane %v2057_v15, 6  ;;  %s2358_s12 = sld [smem:[#allocation28_spill]] }
  0x91   : > { %v482_v30 = vsel %vm404_vm0, %v470_v28, %v471_v29  ;;  %1315 = vmatprep.subr.bf16.mxu0 %v1550_v35  ;;  %1377 = vmatprep.subr.bf16.mxu1 %v1551_v36  ;;  %v1554_v39 = vld [vmem:[#allocation8 + $0xb0] sm:$0xff]   ;;  %v1555_v40 = vld [vmem:[#allocation8 + $0x28] sm:$0xff]   ;;  %v1556_v41 = vld [vmem:[#allocation8 + $0x60] sm:$0xff]   ;;  %v428_v53 = vrot.slane %v2088_v25, 6  ;;  %v422_v55 = vrot.slane %v2060_v16, 6  ;;  %vm509_vm6 = vcmp.ge.s32.totalorder %v2038_v10, 2 }
  0x92   : > { %v1283_v32 = vpack.c.bf16 %v482_v30, %v483_v31  ;;  %1378 = vmatpush3.bf16.msra.mxu1 %v1551_v36  ;;  %v1557_v42 = vld [vmem:[#allocation8 + $0xa8] sm:$0xff]   ;;  %v1558_v43 = vld [vmem:[#allocation8 + $0x20] sm:$0xff]   ;;  %v1559_v44 = vld [vmem:[#allocation8 + $0x58] sm:$0xff]   ;;  %vm510_vm7 = vcmp.ge.s32.totalorder %v2048_v11, 2  ;;  %v472_v59 = vrot.slane %v2073_v21, 2  ;;  %v473_v0 = vrot.slane %v2076_v22, 2 }
  0x93   : > { %1379 = vmatprep.subr.bf16.mxu1 %v1554_v39  ;;  %v1560_v45 = vld [vmem:[#allocation8 + $0xa0] sm:$0xff]   ;;  %v1561_v46 = vld [vmem:[#allocation8 + $0x18] sm:$0xff]   ;;  %v1562_v48 = vld [vmem:[#allocation8 + $0x50] sm:$0xff]   ;;  %v436_v63 = vsel %vm379_vm4, %v428_v53, %v421_v51  ;;  %vm543_vm8 = vcmp.lt.s32.totalorder %v2050_v12, 126  ;;  %vm544_vm9 = vcmp.lt.s32.totalorder %v2052_v13, 126  ;;  %v423_v2 = vrot.slane %v2063_v17, 6 }
  0x94   : > { %1393 = vmatprep.mubr.msk.bf16.mxu1 %vm1282_vm3, %v1283_v32  ;;  %1316 = vmatpush3.bf16.msra.mxu0 %v1552_v37  ;;  %v1563_v47 = vld [vmem:[#allocation8 + $0x98] sm:$0xff]   ;;  %v1564_v49 = vld [vmem:[#allocation8 + $0x10] sm:$0xff]   ;;  %v1565_v52 = vld [vmem:[#allocation8 + $0x48] sm:$0xff]   ;;  %v424_v3 = vrot.slane %v2073_v21, 6  ;;  %v474_v7 = vrot.slane %v2079_v23, 2  ;;  %v475_v8 = vrot.slane %v2085_v24, 2  ;;  %v435_v28 = vsel %vm379_vm4, %v421_v51, %v422_v55 }
  0x95   : > { %1317 = vmatprep.subr.bf16.mxu0 %v1553_v38  ;;  %v1566_v50 = vld [vmem:[#allocation8 + $0x90] sm:$0xff]   ;;  %v1567_v54 = vld [vmem:[#allocation8 + $0x8] sm:$0xff]   ;;  %v363_v57 = vld [vmem:[#allocation2] sm:$0xff]  ;;  %vm545_vm10 = vcmp.lt.s32.totalorder %v2054_v14, 126  ;;  %vm546_vm11 = vcmp.lt.s32.totalorder %v2065_v18, 126  ;;  %v476_v35 = vrot.slane %v2088_v25, 2  ;;  %v480_v38 = vsel %vm404_vm0, %v472_v59, %v473_v0 }
  0x96   : > { %1380 = vmatpush3.bf16.msra.mxu1 %v1554_v39  ;;  %v1569_v56 = vld [vmem:[#allocation8 + $0x88] sm:$0xff]   ;;  %v1568_v60 = vld [vmem:[#allocation8 + $0x40] sm:$0xff]   ;;  %v371_v61 = vrot.slane %v363_v57, 6  ;;  %v395_v5 = vld [vmem:[#allocation3 + $0x38] sm:$0xff]  ;;  %v481_v10 = vsel %vm404_vm0, %v471_v29, %v472_v59  ;;  %v578_v39 = vpack.c.bf16 %v2073_v21, %v2063_v17  ;;  %v433_v29 = vsel %vm379_vm4, %v423_v2, %v424_v3  ;;  %s2359_s5 = sld [smem:[#allocation30_spill]]  ;;  %s1304_s19 = sshll.u32 %s1792_s24, 3 }
  0x97   : > { %1381 = vmatprep.subr.bf16.mxu1 %v1557_v42  ;;  %v364_v58 = vld [vmem:[#allocation2 + $0x8] sm:$0xff]  ;;  %v388_v4 = vld [vmem:[#allocation3] sm:$0xff]  ;;  %vm2165_vm12 = vmpackc.low %vm510_vm7, %vm509_vm6  ;;  %v403_v34 = vrot.slane %v395_v5, 2  ;;  %vm468_vm15 = vcmp.lt.s32.totalorder %v2035_v9, 62  ;;  %vm511_vm1 = vcmp.ge.s32.totalorder %v2050_v12, 2  ;;  %vm512_vm2 = vcmp.ge.s32.totalorder %v2052_v13, 2 }
  0x98   : > { %1318 = vmatpush3.bf16.msra.mxu0 %v1555_v40  ;;  %v372_v62 = vrot.slane %v364_v58, 6  ;;  %v1570_v26 = vld [vmem:[#allocation8] sm:$0xff]   ;;  %v396_v33 = vrot.slane %v388_v4, 2  ;;  %v1572_v36 = vld [vmem:[#allocation10 + $0x38] sm:$0xff]   ;;  %v1573_v11 = vld [vmem:[#allocation10 + $0x30] sm:$0xff]   ;;  %v478_v40 = vsel %vm404_vm0, %v474_v7, %v475_v8  ;;  %v477_v9 = vsel %vm404_vm0, %v475_v8, %v476_v35  ;;  %s1305_s8 = sshll.u32 %s1796_s25, 4 }
  0x99   : > { %1319 = vmatprep.subr.bf16.mxu0 %v1556_v41  ;;  %v1571_v31 = vld [vmem:[#allocation8 + $0x80] sm:$0xff]   ;;  %v479_v41 = vsel %vm404_vm0, %v473_v0, %v474_v7  ;;  %vm1285_vm13 = vmpackc.low %vm544_vm9, %vm543_vm8  ;;  %v426_v12 = vrot.slane %v2079_v23, 6  ;;  %vm548_vm6 = vcmp.lt.s32.totalorder %v2070_v20, 126  ;;  %vm514_vm8 = vcmp.ge.s32.totalorder %v2065_v18, 2  ;;  %v1574_v57 = vld [vmem:[#allocation10 + $0x28] sm:$0xff]   ;;  %s1091_s20 = sadd.s32 %s1305_s8, %s1304_s19  ;;  %s1094_s6 = sshll.u32 %s2116_s11, 4  ;;  %s2261_s6 = int_to_ptr.vmem [resolvable:$true] %s1094_s6 }
  0x9a   : > { %1382 = vmatpush3.bf16.msra.mxu1 %v1557_v42  ;;  %v386_v6 = vsel %vm379_vm4, %v371_v61, %v372_v62  ;;  %v1286_v42 = vpack.c.bf16 %v480_v38, %v481_v10  ;;  %vm1288_vm14 = vmpackc.low %vm546_vm11, %vm545_vm10  ;;  %vm515_vm10 = vcmp.ge.s32.totalorder %v2067_v19, 2  ;;  %vm516_vm11 = vcmp.ge.s32.totalorder %v2070_v20, 2  ;;  %v1575_v58 = vld [vmem:[#allocation10 + $0x20] sm:$0xff]   ;;  %v1577_v1 = vld [vmem:[#allocation10 + $0x10] sm:$0xff]   ;;  %s1306_s13 = sshll.u32 %s1091_s20, 7  ;;  %s2361_s21 = sld [smem:[#allocation31_spill]] }
  0x9b   : > { %1383 = vmatprep.subr.bf16.mxu1 %v1560_v45  ;;  %v453_v30 = vsel %vm413_vm5, %v436_v63, %v386_v6  ;;  %vm1273_vm3 = vmpackc.low %vm512_vm2, %vm511_vm1  ;;  %vm547_vm5 = vcmp.lt.s32.totalorder %v2067_v19, 126  ;;  %v1578_v19 = vld [vmem:[#allocation10 + $0x8] sm:$0xff]   ;;  %v1579_v20 = vld [vmem:[#allocation10] sm:$0xff]   ;;  %s1079_s15 = scalar_lea.sflag [#allocation7], %s2001_s29  ;;  %s1704_s3 = scalar_lea.vmem %s2261_s6, 1024 }
  0x9c   : > { %1320 = vmatpush3.bf16.msra.mxu0 %v1558_v43  ;;  %v1271_v37 = vpack.c.bf16 %v435_v28, %v453_v30  ;;  %v1289_v43 = vpack.c.bf16 %v478_v40, %v479_v41  ;;  %vm1291_vm7 = vmpackc.low %vm548_vm6, %vm547_vm5  ;;  %v1245_v61 = vld [vmem:[%s2358_s12] ss:$0 sm:$0xff]  ;;  %p1705_p6 = scmp.ne.s32.totalorder %s2261_s6, %s1704_s3  ;;  %s1819_s30 = smov [#allocation11]  }
  0x9d   : > { %1321 = vmatprep.subr.bf16.mxu0 %v1559_v44  ;;  %v434_v44 = vsel %vm379_vm4, %v422_v55, %v423_v2  ;;  %v427_v55 = vrot.slane %v2085_v24, 6  ;;  %s1708_s16 = sshll.u32 %s1819_s30, 4  ;;  %s1709_s16 = int_to_ptr.vmem [resolvable:$false] %s1708_s16 }
  0x9e   : > { %1384 = vmatpush3.bf16.msra.mxu1 %v1560_v45  ;;  %v412_v45 = vsel %vm404_vm0, %v403_v34, %v396_v33  ;;  %p1706_p10 = pnand %p1705_p6, %p1968_p5  ;;  %s1710_s7 = scalar_lea.vmem %s1709_s16, 2048 }
  0x9f   : > { %1385 = vmatprep.subr.bf16.mxu1 %v1563_v47  ;;  %p1711_p7 = scmp.lt.s32.totalorder %s2261_s6, %s1709_s16  ;;  %p1712_p8 = scmp.lt.s32.totalorder %s1710_s7, %s1704_s3 }
  0xa0   : > { %1322 = vmatpush3.bf16.msra.mxu0 %v1561_v46  ;;  %v484_v46 = vsel %vm404_vm0, %v476_v35, %v469_v27  ;;  %v425_v27 = vrot.slane %v2076_v22, 6  ;;  %vm513_vm0 = vcmp.ge.s32.totalorder %v2054_v14, 2  ;;  %v430_v14 = vsel %vm379_vm4, %v426_v12, %v427_v55  ;;  %s2362_s18 = smov %s2361_s21  ;;  %s2259_s9 = scalar_lea.hbm %s2361_s21, %s1306_s13 }
  0xa1   : > { %1323 = vmatprep.subr.bf16.mxu0 %v1562_v48  ;;  %v1274_v48 = vpack.c.bf16 %v433_v29, %v434_v44  ;;  %vm1276_vm9 = vmpackc.low %vm514_vm8, %vm513_vm0  ;;  %p1707_p11 = pneg %p1706_p10  ;;  %p1713_p2 = por %p1712_p8, %p1711_p7 }
  0xa2   : > { %1386 = vmatpush3.bf16.msra.mxu1 %v1563_v47  ;;  %v579_v47 = vpack.c.bf16 %v2079_v23, %v2076_v22  ;;  %v432_v51 = vsel %vm379_vm4, %v424_v3, %v425_v27 }
  0xa3   : > { %1387 = vmatprep.subr.bf16.mxu1 %v1566_v50  ;;  %p1714_p12 = pnand %p1713_p2, %p1707_p11 }
  0xa4   : > { %1324 = vmatpush3.bf16.msra.mxu0 %v1564_v49  ;;  %v508_v49 = vsel %vm468_vm15, %v484_v46, %v412_v45 }
  0xa5   : > { %1325 = vmatprep.subr.bf16.mxu0 %v1565_v52  ;;  %v1292_v13 = vpack.c.bf16 %v508_v49, %v477_v9 }
  0xa6   : > { %1388 = vmatpush3.bf16.msra.mxu1 %v1566_v50  ;;  %v431_v50 = vsel %vm379_vm4, %v425_v27, %v426_v12 }
  0xa7   : > { %1389 = vmatprep.subr.bf16.mxu1 %v1569_v56  ;;  %v1277_v52 = vpack.c.bf16 %v431_v50, %v432_v51 }
  0xa8   : > { %1326 = vmatpush3.bf16.msra.mxu0 %v1567_v54  ;;  %v580_v54 = vpack.c.bf16 %v2088_v25, %v2085_v24 }
  0xa9   : > { %1327 = vmatprep.subr.bf16.mxu0 %v1568_v60 }
  0xaa   : > { %1390 = vmatpush3.bf16.msra.mxu1 %v1569_v56  ;;  %v429_v56 = vsel %vm379_vm4, %v427_v55, %v428_v53  ;;  %v1576_v53 = vld [vmem:[#allocation10 + $0x18] sm:$0xff]  }
  0xab   : > { %1391 = vmatprep.subr.bf16.mxu1 %v1571_v31  ;;  %v1280_v18 = vpack.c.bf16 %v429_v56, %v430_v14 }
  0xac   : > { %1328 = vmatpush3.bf16.msra.mxu0 %v1570_v26 }
  0xad   : > { %1401 = vmatprep.subr.bf16.mxu0 %v1572_v36 }
  0xae   : > { %1392 = vmatpush3.bf16.msra.mxu1 %v1571_v31 }
  0xaf   : > { %1272 = vmatmul.mubr.msk.bf16.vlgmr.msra.gmra.mxu0 %vm2165_vm12, %v1271_v37  ;;  %1425 = vmatprep.subr.bf16.mxu1 %v1572_v36  ;;  %vm1279_vm12 = vmpackc.low %vm516_vm11, %vm515_vm10 }
  0xb0   : > { %824 = vmatprep.mubr.bf16.mxu0 %v578_v39  ;;  %1402 = vmatpush3.bf16.msra.mxu0 %v1572_v36 }
  0xb1   : > { %1403 = vmatprep.subr.bf16.mxu0 %v1573_v11  ;;  %1394 = vmatmul.mubr.msk.bf16.vlgmr.msra.gmra.mxu1 %vm1285_vm13, %v1286_v42 }
  0xb2   : > { %1397 = vmatprep.mubr.msk.bf16.mxu1 %vm1288_vm14, %v1289_v43  ;;  %1433 = vmatpush3.bf16.msra.mxu1 %v1572_v36 }
  0xb3   : > { %1426 = vmatprep.subr.bf16.mxu1 %v1573_v11 }
  0xb4   : > { %1404 = vmatpush3.bf16.msra.mxu0 %v1573_v11 }
  0xb5   : > { %1405 = vmatprep.subr.bf16.mxu0 %v1574_v57 }
  0xb6   : > { %1434 = vmatpush3.bf16.msra.mxu1 %v1573_v11 }
  0xb7   : > { %1275 = vmatmul.mubr.msk.bf16.gmra.mxu0 %vm1273_vm3, %v1274_v48  ;;  %1427 = vmatprep.subr.bf16.mxu1 %v1574_v57 }
  0xb8   : > { %832 = vmatprep.mubr.bf16.mxu0 %v579_v47  ;;  %1406 = vmatpush3.bf16.msra.mxu0 %v1574_v57 }
  0xb9   : > { %1398 = vmatmul.mubr.msk.bf16.gmra.mxu1 %vm1291_vm7, %v1292_v13  ;;  %1407 = vmatprep.subr.bf16.mxu0 %v1575_v58 }
  0xba   : > { %1435 = vmatpush3.bf16.msra.mxu1 %v1574_v57 }
  0xbb   : > { %1428 = vmatprep.subr.bf16.mxu1 %v1575_v58 }
  0xbc   : > { %1408 = vmatpush3.bf16.msra.mxu0 %v1575_v58 }
  0xbd   : > { %1409 = vmatprep.subr.bf16.mxu0 %v1576_v53 }
  0xbe   : > { %1436 = vmatpush3.bf16.msra.mxu1 %v1575_v58 }
  0xbf   : > { %1278 = vmatmul.mubr.msk.bf16.gmra.mxu0 %vm1276_vm9, %v1277_v52  ;;  %1429 = vmatprep.subr.bf16.mxu1 %v1576_v53 }
  0xc0   : > { %840 = vmatprep.mubr.bf16.mxu0 %v580_v54  ;;  %1410 = vmatpush3.bf16.msra.mxu0 %v1576_v53 }
  0xc1   : > { %1411 = vmatprep.subr.bf16.mxu0 %v1577_v1 }
  0xc2   : > { %1437 = vmatpush3.bf16.msra.mxu1 %v1576_v53 }
  0xc3   : > { %1430 = vmatprep.subr.bf16.mxu1 %v1577_v1 }
  0xc4   : > { %1412 = vmatpush3.bf16.msra.mxu0 %v1577_v1 }
  0xc5   : > { %1413 = vmatprep.subr.bf16.mxu0 %v1578_v19 }
  0xc6   : > { %1438 = vmatpush3.bf16.msra.mxu1 %v1577_v1 }
  0xc7   : > { %1281 = vmatmul.mubr.msk.bf16.gmra.mxu0 %vm1279_vm12, %v1280_v18  ;;  %1431 = vmatprep.subr.bf16.mxu1 %v1578_v19 }
  0xc8   : > { %1414 = vmatpush3.bf16.msra.mxu0 %v1578_v19 }
  0xc9   : > { %1415 = vmatprep.subr.bf16.mxu0 %v1579_v20 }
  0xca   : > { %1439 = vmatpush3.bf16.msra.mxu1 %v1578_v19 }
  0xcb   : > { %1432 = vmatprep.subr.bf16.mxu1 %v1579_v20 }
  0xcc   : > { %1416 = vmatpush3.bf16.msra.mxu0 %v1579_v20 }
  0xce   : > { %1440 = vmatpush3.bf16.msra.mxu1 %v1579_v20 }
 0x16f   : > { %v1329_v59 = vpop.f32.mrf.mxu0 }
 0x171   : > { %v1330_v60 = vpop.f32.mrf.mxu0  ;;  %v1395_v63 = vpop.f32.mrf.mxu1 }
 0x172   : > { %v1331_v62 = vadd.f32 %v1330_v60, %v1329_v59 }
 0x173   : > { %v1332_v0 = vpop.f32.mrf.mxu0  ;;  %v883_v3 = vpop.f32.mrf.mxu1 }
 0x174   : > { %v819_v2 = vadd.f32 %v1331_v62, %v1245_v61 }
 0x175   : > { %v1333_v4 = vpop.f32.mrf.mxu0  ;;  %v1396_v6 = vpop.f32.mrf.mxu1 }
 0x176   : > { %v1334_v5 = vadd.f32 %v1333_v4, %v1332_v0  ;;  %v884_v8 = vadd.f32 %v883_v3, %v819_v2  ;;  %v1294_v2 = vld [vmem:[%s2359_s5] ss:$0 sm:$0xff] }
 0x177   : > { %v1335_v7 = vpop.f32.mrf.mxu0  ;;  %v886_v28 = vpop.f32.mrf.mxu1 }
 0x178   : > { %v822_v26 = vadd.f32 %v1334_v5, %v1245_v61  ;;  %v914_v35 = vmax.f32 %v884_v8, 0.0 }
 0x179   : > { %v1336_v30 = vpop.f32.mrf.mxu0  ;;  %v1399_v34 = vpop.f32.mrf.mxu1 }
 0x17a   : > { %v1337_v31 = vadd.f32 %v1336_v30, %v1335_v7  ;;  %v887_v32 = vadd.f32 %v886_v28, %v822_v26 }
 0x17b   : > { %v1338_v33 = vpop.f32.mrf.mxu0  ;;  %v899_v40 = vpop.f32.mrf.mxu1 }
 0x17c   : > { %v827_v36 = vadd.f32 %v1337_v31, %v1245_v61  ;;  %v915_v37 = vmax.f32 %v887_v32, 0.0 }
 0x17d   : > { %v1339_v38 = vpop.f32.mrf.mxu0  ;;  %v1400_v46 = vpop.f32.mrf.mxu1 }
 0x17e   : > { %v922_v10 = vpack.c.bf16 %v915_v37, %v914_v35  ;;  %v1340_v11 = vadd.f32 %v1339_v38, %v1338_v33  ;;  %v892_v41 = vadd.f32 %v1395_v63, %v827_v36 }
 0x17f   : > { %v1341_v39 = vpop.f32.mrf.mxu0  ;;  %v902_v50 = vpop.f32.mrf.mxu1 }
 0x180   : > { %v830_v42 = vadd.f32 %v1340_v11, %v1245_v61  ;;  %1417 = vmatprep.mubr.bf16.mxu0 %v922_v10  ;;  %v916_v47 = vmax.f32 %v892_v41, 0.0 }
 0x181   : > { %v1342_v29 = vpop.f32.mrf.mxu0 }
 0x182   : > { %v895_v43 = vadd.f32 %v1396_v6, %v830_v42  ;;  %v1343_v44 = vadd.f32 %v1342_v29, %v1341_v39 }
 0x183   : > { %v1344_v45 = vpop.f32.mrf.mxu0 }
 0x184   : > { %v917_v48 = vmax.f32 %v895_v43, 0.0  ;;  %v835_v9 = vadd.f32 %v1343_v44, %v1245_v61 }
 0x185   : > { %v1345_v49 = vpop.f32.mrf.mxu0 }
 0x186   : > { %v923_v27 = vpack.c.bf16 %v917_v48, %v916_v47  ;;  %v1346_v12 = vadd.f32 %v1345_v49, %v1344_v45  ;;  %v900_v51 = vadd.f32 %v899_v40, %v835_v9 }
 0x187   : > { %v1347_v13 = vpop.f32.mrf.mxu0 }
 0x188   : > { %1418 = vmatmul.mubr.bf16.vlgmr.msra.gmra.mxu0 %v923_v27  ;;  %v838_v52 = vadd.f32 %v1346_v12, %v1245_v61  ;;  %v918_v18 = vmax.f32 %v900_v51, 0.0 }
 0x189   : > { %v1348_v54 = vpop.f32.mrf.mxu0 }
 0x18a   : > { %v1349_v55 = vadd.f32 %v1348_v54, %v1347_v13  ;;  %v903_v56 = vadd.f32 %v902_v50, %v838_v52 }
 0x18b   : > { %v1350_v14 = vpop.f32.mrf.mxu0 }
 0x18c   : > { %v843_v57 = vadd.f32 %v1349_v55, %v1245_v61  ;;  %v919_v58 = vmax.f32 %v903_v56, 0.0 }
 0x18d   : > { %v1351_v53 = vpop.f32.mrf.mxu0 }
 0x18e   : > { %v924_v1 = vpack.c.bf16 %v919_v58, %v918_v18  ;;  %v1352_v19 = vadd.f32 %v1351_v53, %v1350_v14  ;;  %v908_v20 = vadd.f32 %v1399_v34, %v843_v57 }
 0x190   : > { %v846_v59 = vadd.f32 %v1352_v19, %v1245_v61  ;;  %1421 = vmatprep.mubr.bf16.mxu1 %v924_v1  ;;  %v920_v62 = vmax.f32 %v908_v20, 0.0 }
 0x192   : > { %v911_v60 = vadd.f32 %v1400_v46, %v846_v59 }
 0x194   : > { %v921_v63 = vmax.f32 %v911_v60, 0.0 }
 0x196   : > { %v925_v0 = vpack.c.bf16 %v921_v63, %v920_v62 }
 0x198   : > { %1422 = vmatmul.mubr.bf16.vlgmr.msra.gmra.mxu1 %v925_v0 }
 0x248   : > { %v1419_v3 = vpop.f32.mrf.mxu0 }
 0x249   : > { %v1040_v4 = vadd.f32 %v1419_v3, %v1294_v2 }
 0x24a   : > { %v1031_v5 = vpop.f32.mrf.mxu0 }
 0x24b   : > { %v1064_v61 = vadd.f32 %v1040_v4, %v2063_v17  ;;  %v1032_v6 = vadd.f32 %v1294_v2, %v1031_v5 }
 0x24c   : > { %v1420_v7 = vpop.f32.mrf.mxu0 }
 0x24d   : > { %1072 = vst [vmem:[%s2116_s11 + $0x10] sm:$0xff] %v1064_v61  ;;  %v1062_v8 = vadd.f32 %v1032_v6, %v2057_v15  ;;  %v1043_v26 = vadd.f32 %v1420_v7, %v1294_v2 }
 0x24e   : > { %v1034_v28 = vpop.f32.mrf.mxu0 }
 0x24f   : > { %1070 = vst [vmem:[%s2116_s11] sm:$0xff] %v1062_v8  ;;  %v1065_v30 = vadd.f32 %v1043_v26, %v2073_v21  ;;  %v1035_v31 = vadd.f32 %v1294_v2, %v1034_v28 }
 0x251   : > { %1073 = vst [vmem:[%s2116_s11 + $0x18] sm:$0xff] %v1065_v30  ;;  %v1063_v32 = vadd.f32 %v1035_v31, %v2060_v16 }
 0x253   : > { %1071 = vst [vmem:[%s2116_s11 + $0x8] sm:$0xff] %v1063_v32 }
 0x258   : > { %v1423_v17 = vpop.f32.mrf.mxu1 }
 0x259   : > { %v1056_v33 = vadd.f32 %v1423_v17, %v1294_v2 }
 0x25a   : > { %v1047_v34 = vpop.f32.mrf.mxu1 }
 0x25b   : > { %v1068_v15 = vadd.f32 %v1056_v33, %v2085_v24  ;;  %v1048_v35 = vadd.f32 %v1294_v2, %v1047_v34 }
 0x25c   : > { %v1424_v21 = vpop.f32.mrf.mxu1 }
 0x25d   : > { %1076 = vst [vmem:[%s2116_s11 + $0x30] sm:$0xff] %v1068_v15  ;;  %v1066_v36 = vadd.f32 %v1048_v35, %v2076_v22  ;;  %v1059_v16 = vadd.f32 %v1424_v21, %v1294_v2 }
 0x25e   : > { %v1050_v37 = vpop.f32.mrf.mxu1 }
 0x25f   : > { %1074 = vst [vmem:[%s2116_s11 + $0x20] sm:$0xff] %v1066_v36  ;;  %v1069_v38 = vadd.f32 %v1059_v16, %v2088_v25  ;;  %v1051_v10 = vadd.f32 %v1294_v2, %v1050_v37 }
 0x261   : > { %1077 = vst [vmem:[%s2116_s11 + $0x38] sm:$0xff] %v1069_v38  ;;  %v1067_v22 = vadd.f32 %v1051_v10, %v2079_v23 }
 0x263   : > { %1075 = vst [vmem:[%s2116_s11 + $0x28] sm:$0xff] %v1067_v22 }
 0x264   : > { %1717 = shalt.err (!%p1714_p12)
}
 0x265   : > { %s1718_s11 = scalar_lea.hbm %s2259_s9, 1024  ;;  %s1722_s14 = scalar_lea.hbm %s2362_s18, 4096 }
 0x266   : > { %p1719_p13 = scmp.ne.s32.totalorder %s2259_s9, %s1718_s11  ;;  %p1723_p0 = scmp.lt.s32.totalorder %s2259_s9, %s2362_s18 }
 0x267   : > { %p1724_p1 = scmp.lt.s32.totalorder %s1722_s14, %s1718_s11 }
 0x268   : > { %p1720_p9 = pnand %p1719_p13, %p1968_p5 }
 0x269   : > { %p1725_p4 = por %p1724_p1, %p1723_p0 }
 0x26a   : > { %p1721_p3 = pneg %p1720_p9 }
 0x26c   : > { %p1726_p6 = pnand %p1725_p4, %p1721_p3 }
 0x26e   : > { %1729 = shalt.err (!%p1726_p6)
}
 0x26f   : > { %s1820_s8 = smov 128   ;;  %s1821_s20 = smov 8  }
 0x270   : > { %1451 = dma.vmem_to_hbm [thread:$0]  (%p1968_p5), %s2261_s6, 1024, %s2259_s9, %s1079_s15, %s1820_s8, %s1820_s8, %s1821_s20  }
 0x271 PF: > { %s2363_s13 = sld [smem:[#allocation23_spill]]  ;;  %p1473_p10 = scmp.ge.s32.totalorder %s1808_s28, 2 }
 0x272   : > { %s2364_s24 = sld [smem:[#allocation24_spill]] }
 0x277   : > { %s1109_s25 = sand.u32 1, %s2363_s13  }
 0x278   : > { %p2365_p11 = scmp.ne.s32.totalorder %s2364_s24, 0  ;;  %s1110_s21 = scalar_lea.sflag [#allocation7], %s1109_s25 }
 0x27a   : > { %p1465_p7 = pnand %p1473_p10, %p2365_p11 }
 0x27c   : > { %p1466_p8 = pneg %p1465_p7 }
 0x27e   : > { %1775 = dma.done.wait (%p1466_p8), %s1110_s21, 1024  }
 0x27f   : > { %1777 = vsyncadd (%p1466_p8), %s1110_s21, 4294966272  ;;  %s23_s28 = sadd.s32 1, %s1808_s28   ;;  %s2366_s29 = sld [smem:[#allocation25_spill]] }
 0x280   : > { %p20_p2 = scmp.ge.s32.totalorder %s23_s28, 6   ;;  %s2367_s21 = smov %s1784_s22 }
 0x281   : > { %s2368_s22 = smov %s1788_s23  ;;  %s2369_s23 = smov %s1981_s10 }
 0x282   : > { %s2370_s24 = smov %s1800_s26  ;;  %s2371_s25 = smov %s1804_s27 }
 0x283   : > { %s2373_s27 = smov %s2379_s17  ;;  %22 = sbr.rel (!%p20_p2) target bundleno = 14 (0xe), region = 105 }
 0x285   : > { %s2372_s26 = smov %s2366_s29 }
 0x288   :  { %1115 = vsyncpa [#allocation6], 1 }
 0x289   :  { %1117 = vsyncpa [#allocation6 + $0x1], 1 }
 0x28a   :  { %1118 = vsyncpa [#allocation9], 1 }
 0x28b   :  { %1119 = vsyncpa [#allocation7], 1 }
 0x28c   :  { %1121 = vsyncpa [#allocation7 + $0x1], 1 }
 0x28d   :  { %1122 = vsyncmov [#allocation4] }
 0x290   :  { %s1123_s2 = vpop.sfrf %1122 }
 0x291   :  { %p1309_p5 = scmp.ne.s32.totalorder %s1123_s2, 0 }
 0x293   :  { %1127 = shalt.err (%p1309_p5)  }
 0x294   :  { %1129 = vsyncmov [#allocation4 + $0x1] }
 0x297   :  { %s1130_s10 = vpop.sfrf %1129 }
 0x298   :  { %p1310_p12 = scmp.ne.s32.totalorder %s1130_s10, 0 }
 0x29a   :  { %1134 = shalt.err (%p1310_p12)  }

</bundles_post_ra>
